<compile_context>
chip_gen: v7x
topology: tpu7x:2x2x1
jax: 0.10.0
libtpu: 0.0.40
codegen_flags: <defaults>
</compile_context>

<pallas_src>
import functools

import jax
import jax.numpy as jnp
from jax.experimental import pallas as pl
from jax.experimental.pallas import tpu as pltpu


def _conv_shift_gemm_kernel(x_ref, w_ref, b_ref, o_ref, *,
                            groups, cout_g, cin_g, shifts, m_lanes):
    """3x3 conv = one GEMM per group + 9 lane-shifted slab accumulations.

    x_ref: (Cin, M)                 padded input; each image owns a `pitch`
                                    (multiple of 128) lane stripe, flat index
                                    inside a stripe is ph*(W+2)+pw.
    w_ref: (groups, 9*cout_g, cin_g) weights, row order (kh, kw, cout).
    b_ref: (Cout, 1)                bias column (zeros if module bias=False).
    o_ref: (Cout, M)                output; valid values at n*pitch+h*(W+2)+w.
    """
    for g in range(groups):  # static unroll; groups is a compile-time constant
        xg = x_ref[...] if groups == 1 else x_ref[g * cin_g:(g + 1) * cin_g, :]

        # One MXU call per group: all 9 taps' partial results at once.
        y = jnp.dot(w_ref[g], xg, preferred_element_type=jnp.float32)

        acc = None
        for t, s in enumerate(shifts):  # 9 taps, static unroll
            slab = y[t * cout_g:(t + 1) * cout_g, :]
            if s:
                # Want slab'[p] = slab[p + s] (shift left by s).  roll is a
                # cyclic rotation over the lane axis; because every image's
                # stripe is padded to a multiple of 128 lanes, the wrapped
                # lanes only ever land in invalid (discarded) positions.
                slab = pltpu.roll(slab, shift=m_lanes - s, axis=1)
            acc = slab if acc is None else acc + slab

        acc = acc + b_ref[g * cout_g:(g + 1) * cout_g, :]  # bcast over lanes

        if groups == 1:
            o_ref[...] = acc.astype(o_ref.dtype)
        else:
            # Direct row-slab write per group; all lanes dense, no concat.
            o_ref[g * cout_g:(g + 1) * cout_g, :] = acc.astype(o_ref.dtype)


def conv2d_3x3_pallas(x_nchw, weight_oihw, bias, *, groups=1):
    """Equivalent of SampleModel.forward: Conv2d(k=3, s=1, p=1, groups=groups)."""
    N, Cin, H, W = x_nchw.shape
    Cout = weight_oihw.shape[0]
    KH = KW = 3
    assert Cin % groups == 0 and Cout % groups == 0
    cin_g, cout_g = Cin // groups, Cout // groups

    Hp, Wp = H + 2, W + 2
    flat = Hp * Wp
    pitch = ((flat + 127) // 128) * 128   # per-image lane stripe, mult of 128
    M = N * pitch

    # ---- input prep (cheap: ~2x input size, no 9x im2col fan-out):
    #      pad spatially, flatten the padded image, lane-pad to `pitch`,
    #      put channels first ->  x_cm[c, n*pitch + ph*Wp + pw].
    xp = jnp.pad(x_nchw, ((0, 0), (0, 0), (1, 1), (1, 1)))      # (N, Cin, Hp, Wp)
    xp = xp.reshape(N, Cin, flat)
    xp = jnp.pad(xp, ((0, 0), (0, 0), (0, pitch - flat)))       # (N, Cin, pitch)
    x_cm = xp.transpose(1, 0, 2).reshape(Cin, M)                # (Cin, M)

    # ---- weight: PyTorch OIHW (Cout, Cin/g, 3, 3) -> (groups, 9*cout_g, cin_g)
    #      with rows ordered (kh, kw, cout) to match the tap slabs.
    w = weight_oihw.reshape(groups, cout_g, cin_g, KH, KW)
    w = w.transpose(0, 3, 4, 1, 2).reshape(groups, KH * KW * cout_g, cin_g)

    if bias is None:
        bias = jnp.zeros((Cout,), x_nchw.dtype)
    b = bias.reshape(Cout, 1)

    # Lane shift for tap (kh, kw) in the padded-flat index space.
    shifts = tuple(kh * Wp + kw for kh in range(KH) for kw in range(KW))

    kernel = functools.partial(
        _conv_shift_gemm_kernel, groups=groups, cout_g=cout_g, cin_g=cin_g,
        shifts=shifts, m_lanes=M)

    out_cm = pl.pallas_call(
        kernel,
        out_shape=jax.ShapeDtypeStruct((Cout, M), x_nchw.dtype),
        grid_spec=pltpu.PrefetchScalarGridSpec(
            num_scalar_prefetch=0,
            grid=(1,),  # single launch; whole problem (~0.4 MB) fits in VMEM
            in_specs=[
                pl.BlockSpec((Cin, M), lambda i: (0, 0)),
                pl.BlockSpec((groups, KH * KW * cout_g, cin_g),
                             lambda i: (0, 0, 0)),
                pl.BlockSpec((Cout, 1), lambda i: (0, 0)),
            ],
            out_specs=pl.BlockSpec((Cout, M), lambda i: (0, 0)),
        ),
        compiler_params=pltpu.CompilerParams(
            dimension_semantics=("arbitrary",),
            vmem_limit_bytes=32 * 1024 * 1024,  # explicit; usage ~1 MB here
        ),
    )(x_cm, w, b)

    # Extract valid lanes: (Cout, M) -> NCHW (tiny: <16 KB of data movement).
    out = out_cm.reshape(Cout, N, pitch)[:, :, :flat]
    out = out.reshape(Cout, N, Hp, Wp)[:, :, :H, :W]
    return out.transpose(1, 0, 2, 3)


if __name__ == "__main__":
    # Module constructor choices for SampleModel
    BIAS = True
    GROUPS = 1

    IN_CH, OUT_CH, K = 256, 16, 3
    N, H, W = 2, 8, 8  # small batch/spatial; channels fixed by the module

    key = jax.random.PRNGKey(0)
    kx, kw, kb = jax.random.split(key, 3)

    x = jax.random.normal(kx, (N, IN_CH, H, W), dtype=jnp.float32)

    # Deterministic Conv2d-style init (kaiming-uniform-ish scale)
    fan_in = (IN_CH // GROUPS) * K * K
    bound = 1.0 / (fan_in ** 0.5)
    weight = jax.random.uniform(
        kw, (OUT_CH, IN_CH // GROUPS, K, K),
        minval=-bound, maxval=bound, dtype=jnp.float32)
    bias = (jax.random.uniform(kb, (OUT_CH,), minval=-bound, maxval=bound,
                               dtype=jnp.float32) if BIAS else None)

    out = conv2d_3x3_pallas(x, weight, bias, groups=GROUPS)
    out = jax.block_until_ready(out)

    # Reference check with XLA's conv (same semantics as PyTorch Conv2d)
    ref = jax.lax.conv_general_dilated(
        x, weight, window_strides=(1, 1), padding=((1, 1), (1, 1)),
        dimension_numbers=("NCHW", "OIHW", "NCHW"),
        feature_group_count=GROUPS)
    if BIAS:
        ref = ref + bias[None, :, None, None]
    ref = jax.block_until_ready(ref)

    assert out.shape == (N, OUT_CH, H, W)
    assert jnp.allclose(out, ref, atol=1e-4, rtol=1e-4)
    print("KERNEL_OK")
</pallas_src>

<mosaic_0001>
module attributes {stable_mosaic.version = 11 : i64} {
  func.func @_conv_shift_gemm_kernel(%arg0: i32, %arg1: memref<256x256xf32, #tpu.memory_space<vmem>>, %arg2: memref<1x144x256xf32, #tpu.memory_space<vmem>>, %arg3: memref<16x1xf32, #tpu.memory_space<vmem>>, %arg4: memref<16x256xf32, #tpu.memory_space<vmem>>) attributes {dimension_semantics = [#tpu.dimension_semantics<arbitrary>], iteration_bounds = array<i64: 1>, scalar_prefetch = 0 : i64, scratch_operands = 0 : i64, tpu.core_type = #tpu.core_type<tc>, window_params = [{pipeline_mode = #tpu.pipeline_mode<synchronous>, transform_indices = @transform_0, window_bounds = array<i64: 256, 256>}, {pipeline_mode = #tpu.pipeline_mode<synchronous>, transform_indices = @transform_1, window_bounds = array<i64: 1, 144, 256>}, {pipeline_mode = #tpu.pipeline_mode<synchronous>, transform_indices = @transform_2, window_bounds = array<i64: 16, 1>}, {pipeline_mode = #tpu.pipeline_mode<synchronous>, transform_indices = @transform_3, window_bounds = array<i64: 16, 256>}]} {
    %c0 = arith.constant 0 : index
    %c0_0 = arith.constant 0 : index
    %0 = vector.load %arg1[%c0, %c0_0] : memref<256x256xf32, #tpu.memory_space<vmem>>, vector<256x256xf32>
    %c0_1 = arith.constant 0 : index
    %c0_2 = arith.constant 0 : index
    %c0_3 = arith.constant 0 : index
    %1 = vector.load %arg2[%c0_1, %c0_2, %c0_3] : memref<1x144x256xf32, #tpu.memory_space<vmem>>, vector<1x144x256xf32>
    %2 = vector.shape_cast %1 : vector<1x144x256xf32> to vector<144x256xf32>
    %cst = arith.constant dense<0.000000e+00> : vector<144x256xf32>
    %3 = tpu.matmul %2, %0, %cst {dimension_numbers = #tpu.dot_dimension_numbers<[1], [0], [0], [1], [0, 0, 1, 1], [], []>} : vector<144x256xf32>, vector<256x256xf32>, vector<144x256xf32> -> vector<144x256xf32>
    %4 = vector.extract_strided_slice %3 {offsets = [0, 0], sizes = [16, 256], strides = [1, 1]} : vector<144x256xf32> to vector<16x256xf32>
    %5 = vector.extract_strided_slice %3 {offsets = [16, 0], sizes = [16, 256], strides = [1, 1]} : vector<144x256xf32> to vector<16x256xf32>
    %c255_i32 = arith.constant 255 : i32
    %6 = tpu.dynamic_rotate %5 by %c255_i32 dim 1 : vector<16x256xf32>, i32 -> vector<16x256xf32>
    %7 = arith.addf %4, %6 : vector<16x256xf32>
    %8 = vector.extract_strided_slice %3 {offsets = [32, 0], sizes = [16, 256], strides = [1, 1]} : vector<144x256xf32> to vector<16x256xf32>
    %c254_i32 = arith.constant 254 : i32
    %9 = tpu.dynamic_rotate %8 by %c254_i32 dim 1 : vector<16x256xf32>, i32 -> vector<16x256xf32>
    %10 = arith.addf %7, %9 : vector<16x256xf32>
    %11 = vector.extract_strided_slice %3 {offsets = [48, 0], sizes = [16, 256], strides = [1, 1]} : vector<144x256xf32> to vector<16x256xf32>
    %c246_i32 = arith.constant 246 : i32
    %12 = tpu.dynamic_rotate %11 by %c246_i32 dim 1 : vector<16x256xf32>, i32 -> vector<16x256xf32>
    %13 = arith.addf %10, %12 : vector<16x256xf32>
    %14 = vector.extract_strided_slice %3 {offsets = [64, 0], sizes = [16, 256], strides = [1, 1]} : vector<144x256xf32> to vector<16x256xf32>
    %c245_i32 = arith.constant 245 : i32
    %15 = tpu.dynamic_rotate %14 by %c245_i32 dim 1 : vector<16x256xf32>, i32 -> vector<16x256xf32>
    %16 = arith.addf %13, %15 : vector<16x256xf32>
    %17 = vector.extract_strided_slice %3 {offsets = [80, 0], sizes = [16, 256], strides = [1, 1]} : vector<144x256xf32> to vector<16x256xf32>
    %c244_i32 = arith.constant 244 : i32
    %18 = tpu.dynamic_rotate %17 by %c244_i32 dim 1 : vector<16x256xf32>, i32 -> vector<16x256xf32>
    %19 = arith.addf %16, %18 : vector<16x256xf32>
    %20 = vector.extract_strided_slice %3 {offsets = [96, 0], sizes = [16, 256], strides = [1, 1]} : vector<144x256xf32> to vector<16x256xf32>
    %c236_i32 = arith.constant 236 : i32
    %21 = tpu.dynamic_rotate %20 by %c236_i32 dim 1 : vector<16x256xf32>, i32 -> vector<16x256xf32>
    %22 = arith.addf %19, %21 : vector<16x256xf32>
    %23 = vector.extract_strided_slice %3 {offsets = [112, 0], sizes = [16, 256], strides = [1, 1]} : vector<144x256xf32> to vector<16x256xf32>
    %c235_i32 = arith.constant 235 : i32
    %24 = tpu.dynamic_rotate %23 by %c235_i32 dim 1 : vector<16x256xf32>, i32 -> vector<16x256xf32>
    %25 = arith.addf %22, %24 : vector<16x256xf32>
    %26 = vector.extract_strided_slice %3 {offsets = [128, 0], sizes = [16, 256], strides = [1, 1]} : vector<144x256xf32> to vector<16x256xf32>
    %c234_i32 = arith.constant 234 : i32
    %27 = tpu.dynamic_rotate %26 by %c234_i32 dim 1 : vector<16x256xf32>, i32 -> vector<16x256xf32>
    %28 = arith.addf %25, %27 : vector<16x256xf32>
    %c0_4 = arith.constant 0 : index
    %c0_5 = arith.constant 0 : index
    %29 = vector.load %arg3[%c0_4, %c0_5] : memref<16x1xf32, #tpu.memory_space<vmem>>, vector<16x1xf32>
    %30 = vector.broadcast %29 : vector<16x1xf32> to vector<16x256xf32>
    %31 = arith.addf %28, %30 : vector<16x256xf32>
    %c0_6 = arith.constant 0 : index
    %c0_7 = arith.constant 0 : index
    %32 = vector.load %arg4[%c0_6, %c0_7] : memref<16x256xf32, #tpu.memory_space<vmem>>, vector<16x256xf32>
    tpu.vector_store %arg4[%c0_6, %c0_7], %31 {strides = array<i32>} : memref<16x256xf32, #tpu.memory_space<vmem>>, vector<16x256xf32>,
    return
  }
  func.func @transform_0(%arg0: i32) -> (i32, i32) {
    %c0_i32 = arith.constant 0 : i32
    %c0_i32_0 = arith.constant 0 : i32
    %c0_i32_1 = arith.constant 0 : i32
    return %c0_i32, %c0_i32_0 : i32, i32
  }
  func.func @transform_1(%arg0: i32) -> (i32, i32, i32) {
    %c0_i32 = arith.constant 0 : i32
    %c0_i32_0 = arith.constant 0 : i32
    %c0_i32_1 = arith.constant 0 : i32
    %c0_i32_2 = arith.constant 0 : i32
    return %c0_i32, %c0_i32_0, %c0_i32_1 : i32, i32, i32
  }
  func.func @transform_2(%arg0: i32) -> (i32, i32) {
    %c0_i32 = arith.constant 0 : i32
    %c0_i32_0 = arith.constant 0 : i32
    %c0_i32_1 = arith.constant 0 : i32
    return %c0_i32, %c0_i32_0 : i32, i32
  }
  func.func @transform_3(%arg0: i32) -> (i32, i32) {
    %c0_i32 = arith.constant 0 : i32
    %c0_i32_0 = arith.constant 0 : i32
    %c0_i32_1 = arith.constant 0 : i32
    return %c0_i32, %c0_i32_0 : i32, i32
  }
}

</mosaic_0001>

<bundles_post_ra>
// kernel: tpu_custom_call.1
= control target key start
LH: loop header
LB: loop body
LE: loop exit
PB: predicated region body
PF: predicated region fallthrough
CT: control target
= control target key end

     0   :  { %8 = vsyncpa [#allocation3], 0  ;;  %s883_s0 = inlined_call_operand.hbm [shape: f32[256,256], index: 0, kind: input, shape index: {}]   ;;  %s884_s1 = inlined_call_operand.hbm [shape: f32[1,144,256], index: 1, kind: input, shape index: {}]   ;;  %s885_s2 = inlined_call_operand.vmem [shape: f32[16,1], index: 2, kind: input, shape index: {}]   ;;  %s886_s3 = inlined_call_operand.hbm [shape: f32[16,256], index: 3, kind: output, shape index: {}]  }
   0x1   :  { %9 = vsyncpa [#allocation6], 0 }
   0x2   :  { %10 = vsyncpa [#allocation4], 0  ;;  %s676_s12 = smov [#allocation2]   ;;  %s604_s16 = scalar_lea.hbm %s883_s0, 8192 }
   0x3   :  { %s16_s13 = sshll.u32 %s676_s12, 4  ;;  %p605_p0 = scmp.ne.s32.totalorder %s883_s0, %s604_s16  ;;  %s17_s13 = int_to_ptr.vmem [resolvable:$true] %s16_s13 }
   0x4   :  { %p608_p1 = scmp.lt.u32.totalorder %s604_s16, %s883_s0 }
   0x6   :  { %p610_p2 = pnand %p608_p1, %p605_p0 }
   0x8   :  { %613 = shalt.err (!%p610_p2)
}
   0x9   :  { %s614_s21 = scalar_lea.vmem %s17_s13, 8192  ;;  %p619_p4 = scmp.lt.s32.totalorder %s17_s13, %s17_s13 }
   0xa   :  { %p615_p3 = scmp.ne.s32.totalorder %s17_s13, %s614_s21  ;;  %p620_p5 = scmp.lt.s32.totalorder %s614_s21, %s614_s21 }
   0xc   :  { %p621_p6 = por %p620_p5, %p619_p4 }
   0xe   :  { %p622_p7 = pnand %p621_p6, %p615_p3 }
  0x10   :  { %625 = shalt.err (!%p622_p7)
}
  0x11   :  { %s677_s22 = smov 256   ;;  %s678_s23 = smov 16  }
  0x12   :  { %22 = dma.hbm_to_vmem [thread:$0]  %s883_s0, 8192, %s17_s13, [#allocation3], %s677_s22, %s677_s22, %s678_s23  }
  0x13   :  { %s679_s26 = smov [#allocation5]   ;;  %s626_s30 = scalar_lea.hbm %s884_s1, 4608 }
  0x14   :  { %s28_s27 = sshll.u32 %s679_s26, 4  ;;  %p627_p8 = scmp.ne.s32.totalorder %s884_s1, %s626_s30  ;;  %s29_s27 = int_to_ptr.vmem [resolvable:$true] %s28_s27 }
  0x15   :  { %p630_p9 = scmp.lt.u32.totalorder %s626_s30, %s884_s1 }
  0x17   :  { %p632_p10 = pnand %p630_p9, %p627_p8 }
  0x19   :  { %635 = shalt.err (!%p632_p10)
}
  0x1a   :  { %s636_s8 = scalar_lea.vmem %s29_s27, 4608  ;;  %p641_p12 = scmp.lt.s32.totalorder %s29_s27, %s29_s27 }
  0x1b   :  { %p637_p11 = scmp.ne.s32.totalorder %s29_s27, %s636_s8  ;;  %p642_p13 = scmp.lt.s32.totalorder %s636_s8, %s636_s8 }
  0x1d   :  { %p643_p0 = por %p642_p13, %p641_p12 }
  0x1f   :  { %p644_p1 = pnand %p643_p0, %p637_p11 }
  0x21   :  { %647 = shalt.err (!%p644_p1)
}
  0x22   :  { %34 = dma.hbm_to_vmem [thread:$0]  %s884_s1, 4608, %s29_s27, [#allocation6], %s677_s22, %s677_s22, %s678_s23  }
  0x23   :  { %670 = dma.done.wait [#allocation3], 8192  }
  0x24   :  { %671 = vsyncadd [#allocation3], 4294959104 }
  0x25   :  { %672 = dma.done.wait [#allocation6], 4608  }
  0x26   :  { %673 = vsyncadd [#allocation6], 4294962688  ;;  %v680_v0 = vmov 0   ;;  %v44_v1 = vld [vmem:[#allocation2 + $0x8] sm:$0xff]  ;;  %v46_v2 = vld [vmem:[#allocation2 + $0x18] sm:$0xff]  ;;  %s682_s13 = smov 116  }
  0x27   :  { %603 = vset.pattern.permute.xlu1 %v680_v0  ;;  %602 = vset.pattern.permute.xlu0 %v680_v0  ;;  %v43_v3 = vld [vmem:[#allocation2] sm:$0xff]  ;;  %v492_v4 = vpack.c.bf16 %v46_v2, %v44_v1  ;;  %v45_v5 = vld [vmem:[#allocation2 + $0x10] sm:$0xff]  ;;  %v48_v6 = vld [vmem:[#allocation2 + $0x28] sm:$0xff]  ;;  %s683_s14 = smov 127   ;;  %s684_s15 = smov 108  }
  0x28   :  { %v50_v7 = vld [vmem:[#allocation2 + $0x38] sm:$0xff]  ;;  %v494_v8 = vpack.c.bf16 %v45_v5, %v43_v3  ;;  %v47_v10 = vld [vmem:[#allocation2 + $0x20] sm:$0xff]  ;;  %v49_v11 = vld [vmem:[#allocation2 + $0x30] sm:$0xff]  ;;  %s685_s16 = smov 126   ;;  %s686_s17 = smov 107  }
  0x29   :  { %v496_v9 = vpack.c.bf16 %v50_v7, %v48_v6  ;;  %v52_v12 = vld [vmem:[#allocation2 + $0x48] sm:$0xff]  ;;  %556 = vmatprep.subr.bf16.mxu1 %v492_v4  ;;  %493 = vmatprep.subr.bf16.mxu0 %v492_v4  ;;  %v54_v13 = vld [vmem:[#allocation2 + $0x58] sm:$0xff]  ;;  %v498_v14 = vpack.c.bf16 %v49_v11, %v47_v10  ;;  %v51_v16 = vld [vmem:[#allocation2 + $0x40] sm:$0xff]  ;;  %s687_s18 = smov 118   ;;  %s688_s19 = smov 106  }
  0x2a   :  { %572 = vmatpush1.bf16.msra.mxu1 %v494_v8  ;;  %495 = vmatpush1.bf16.msra.mxu0 %v494_v8  ;;  %v500_v15 = vpack.c.bf16 %v54_v13, %v52_v12  ;;  %v53_v17 = vld [vmem:[#allocation2 + $0x50] sm:$0xff]  ;;  %v56_v18 = vld [vmem:[#allocation2 + $0x68] sm:$0xff]  ;;  %v58_v19 = vld [vmem:[#allocation2 + $0x78] sm:$0xff]  ;;  %s689_s20 = smov [#allocation7]  }
  0x2b   :  { %557 = vmatprep.subr.bf16.mxu1 %v496_v9  ;;  %497 = vmatprep.subr.bf16.mxu0 %v496_v9  ;;  %v502_v20 = vpack.c.bf16 %v53_v17, %v51_v16  ;;  %v504_v21 = vpack.c.bf16 %v58_v19, %v56_v18  ;;  %v55_v22 = vld [vmem:[#allocation2 + $0x60] sm:$0xff]  ;;  %v57_v23 = vld [vmem:[#allocation2 + $0x70] sm:$0xff]  ;;  %v60_v24 = vld [vmem:[#allocation2 + $0x88] sm:$0xff]  ;;  %s479_s21 = sshll.u32 %s689_s20, 4  ;;  %s480_s21 = int_to_ptr.vmem [resolvable:$true] %s479_s21 }
  0x2c   :  { %v62_v25 = vld [vmem:[#allocation2 + $0x98] sm:$0xff]  ;;  %v506_v26 = vpack.c.bf16 %v57_v23, %v55_v22  ;;  %v59_v28 = vld [vmem:[#allocation2 + $0x80] sm:$0xff]  ;;  %v61_v29 = vld [vmem:[#allocation2 + $0x90] sm:$0xff]  ;;  %s648_s24 = scalar_lea.vmem %s480_s21, 512  ;;  %p653_p3 = scmp.lt.s32.totalorder %s480_s21, %s480_s21 }
  0x2d   :  { %v508_v27 = vpack.c.bf16 %v62_v25, %v60_v24  ;;  %v64_v30 = vld [vmem:[#allocation2 + $0xa8] sm:$0xff]  ;;  %v66_v31 = vld [vmem:[#allocation2 + $0xb8] sm:$0xff]  ;;  %v510_v32 = vpack.c.bf16 %v61_v29, %v59_v28  ;;  %v63_v34 = vld [vmem:[#allocation2 + $0xa0] sm:$0xff]  ;;  %p649_p2 = scmp.ne.s32.totalorder %s480_s21, %s648_s24  ;;  %p654_p4 = scmp.lt.s32.totalorder %s648_s24, %s648_s24 }
  0x2e   :  { %573 = vmatpush1.bf16.msra.mxu1 %v498_v14  ;;  %499 = vmatpush1.bf16.msra.mxu0 %v498_v14  ;;  %v512_v33 = vpack.c.bf16 %v66_v31, %v64_v30  ;;  %v65_v35 = vld [vmem:[#allocation2 + $0xb0] sm:$0xff]  ;;  %v68_v36 = vld [vmem:[#allocation2 + $0xc8] sm:$0xff]  ;;  %v70_v37 = vld [vmem:[#allocation2 + $0xd8] sm:$0xff] }
  0x2f   :  { %558 = vmatprep.subr.bf16.mxu1 %v500_v15  ;;  %501 = vmatprep.subr.bf16.mxu0 %v500_v15  ;;  %v514_v38 = vpack.c.bf16 %v65_v35, %v63_v34  ;;  %v516_v39 = vpack.c.bf16 %v70_v37, %v68_v36  ;;  %v67_v40 = vld [vmem:[#allocation2 + $0xc0] sm:$0xff]  ;;  %v69_v41 = vld [vmem:[#allocation2 + $0xd0] sm:$0xff]  ;;  %v126_v42 = vld [vmem:[#allocation5 + $0x98] sm:$0xff]  ;;  %p655_p5 = por %p654_p4, %p653_p3 }
  0x30   :  { %v72_v43 = vld [vmem:[#allocation2 + $0xe8] sm:$0xff]  ;;  %v74_v44 = vld [vmem:[#allocation2 + $0xf8] sm:$0xff]  ;;  %261 = vmatprep.mubr.f32.mxu1 %v126_v42  ;;  %v518_v46 = vpack.c.bf16 %v69_v41, %v67_v40  ;;  %v71_v48 = vld [vmem:[#allocation2 + $0xe0] sm:$0xff] }
  0x31   :  { %v108_v45 = vld [vmem:[#allocation5 + $0x8] sm:$0xff]  ;;  %v520_v47 = vpack.c.bf16 %v74_v44, %v72_v43  ;;  %v73_v49 = vld [vmem:[#allocation2 + $0xf0] sm:$0xff]  ;;  %v78_v51 = vld [vmem:[#allocation2 + $0x118] sm:$0xff]  ;;  %p656_p6 = pnand %p655_p5, %p649_p2 }
  0x32   :  { %574 = vmatpush1.bf16.msra.mxu1 %v502_v20  ;;  %503 = vmatpush1.bf16.msra.mxu0 %v502_v20  ;;  %v76_v50 = vld [vmem:[#allocation2 + $0x108] sm:$0xff]  ;;  %v522_v52 = vpack.c.bf16 %v73_v49, %v71_v48  ;;  %v75_v54 = vld [vmem:[#allocation2 + $0x100] sm:$0xff]  ;;  %v77_v55 = vld [vmem:[#allocation2 + $0x110] sm:$0xff] }
  0x33   :  { %559 = vmatprep.subr.bf16.mxu1 %v504_v21  ;;  %505 = vmatprep.subr.bf16.mxu0 %v504_v21  ;;  %v524_v53 = vpack.c.bf16 %v78_v51, %v76_v50  ;;  %v80_v56 = vld [vmem:[#allocation2 + $0x128] sm:$0xff]  ;;  %v82_v57 = vld [vmem:[#allocation2 + $0x138] sm:$0xff]  ;;  %v526_v58 = vpack.c.bf16 %v77_v55, %v75_v54  ;;  %v79_v59 = vld [vmem:[#allocation2 + $0x120] sm:$0xff] }
  0x34   :  { %207 = vmatprep.mubr.f32.mxu0 %v108_v45  ;;  %v528_v60 = vpack.c.bf16 %v82_v57, %v80_v56  ;;  %v81_v61 = vld [vmem:[#allocation2 + $0x130] sm:$0xff]  ;;  %v455_v62 = vld [vmem:[%s885_s2 + $0x8] sm:$0xff]  ;;  %v454_v63 = vld [vmem:[%s885_s2] sm:$0xff]  ;;  %s681_s2 = smov 117  }
  0x35   :  { %v84_v0 = vld [vmem:[#allocation2 + $0x148] sm:$0xff]  ;;  %v86_v1 = vld [vmem:[#allocation2 + $0x158] sm:$0xff]  ;;  %463 = vperm.xlu1 %603, %v455_v62   ;;  %458 = vperm.xlu0 %602, %v454_v63   ;;  %v530_v2 = vpack.c.bf16 %v81_v61, %v79_v59  ;;  %v83_v4 = vld [vmem:[#allocation2 + $0x140] sm:$0xff] }
  0x36   :  { %575 = vmatpush1.bf16.msra.mxu1 %v506_v26  ;;  %507 = vmatpush1.bf16.msra.mxu0 %v506_v26  ;;  %v532_v3 = vpack.c.bf16 %v86_v1, %v84_v0  ;;  %v85_v5 = vld [vmem:[#allocation2 + $0x150] sm:$0xff]  ;;  %v88_v6 = vld [vmem:[#allocation2 + $0x168] sm:$0xff]  ;;  %v90_v7 = vld [vmem:[#allocation2 + $0x178] sm:$0xff] }
  0x37   :  { %560 = vmatprep.subr.bf16.mxu1 %v508_v27  ;;  %509 = vmatprep.subr.bf16.mxu0 %v508_v27  ;;  %v534_v8 = vpack.c.bf16 %v85_v5, %v83_v4  ;;  %v536_v9 = vpack.c.bf16 %v90_v7, %v88_v6  ;;  %v87_v10 = vld [vmem:[#allocation2 + $0x160] sm:$0xff]  ;;  %v89_v11 = vld [vmem:[#allocation2 + $0x170] sm:$0xff]  ;;  %v92_v12 = vld [vmem:[#allocation2 + $0x188] sm:$0xff] }
  0x38   :  { %v94_v13 = vld [vmem:[#allocation2 + $0x198] sm:$0xff]  ;;  %v538_v14 = vpack.c.bf16 %v89_v11, %v87_v10  ;;  %v91_v16 = vld [vmem:[#allocation2 + $0x180] sm:$0xff]  ;;  %v93_v17 = vld [vmem:[#allocation2 + $0x190] sm:$0xff] }
  0x39   :  { %v540_v15 = vpack.c.bf16 %v94_v13, %v92_v12  ;;  %v96_v18 = vld [vmem:[#allocation2 + $0x1a8] sm:$0xff]  ;;  %v98_v19 = vld [vmem:[#allocation2 + $0x1b8] sm:$0xff]  ;;  %v542_v20 = vpack.c.bf16 %v93_v17, %v91_v16  ;;  %v95_v22 = vld [vmem:[#allocation2 + $0x1a0] sm:$0xff] }
  0x3a   :  { %576 = vmatpush1.bf16.msra.mxu1 %v510_v32  ;;  %511 = vmatpush1.bf16.msra.mxu0 %v510_v32  ;;  %v544_v21 = vpack.c.bf16 %v98_v19, %v96_v18  ;;  %v97_v23 = vld [vmem:[#allocation2 + $0x1b0] sm:$0xff]  ;;  %v100_v24 = vld [vmem:[#allocation2 + $0x1c8] sm:$0xff]  ;;  %v102_v25 = vld [vmem:[#allocation2 + $0x1d8] sm:$0xff] }
  0x3b   :  { %561 = vmatprep.subr.bf16.mxu1 %v512_v33  ;;  %513 = vmatprep.subr.bf16.mxu0 %v512_v33  ;;  %v546_v26 = vpack.c.bf16 %v97_v23, %v95_v22  ;;  %v548_v27 = vpack.c.bf16 %v102_v25, %v100_v24  ;;  %v99_v28 = vld [vmem:[#allocation2 + $0x1c0] sm:$0xff]  ;;  %v101_v29 = vld [vmem:[#allocation2 + $0x1d0] sm:$0xff]  ;;  %v104_v30 = vld [vmem:[#allocation2 + $0x1e8] sm:$0xff] }
  0x3c   :  { %v106_v31 = vld [vmem:[#allocation2 + $0x1f8] sm:$0xff]  ;;  %v550_v32 = vpack.c.bf16 %v101_v29, %v99_v28  ;;  %v103_v34 = vld [vmem:[#allocation2 + $0x1e0] sm:$0xff]  ;;  %v105_v35 = vld [vmem:[#allocation2 + $0x1f0] sm:$0xff] }
  0x3d   :  { %v552_v33 = vpack.c.bf16 %v106_v31, %v104_v30  ;;  %v554_v36 = vpack.c.bf16 %v105_v35, %v103_v34  ;;  %v125_v37 = vld [vmem:[#allocation5 + $0x90] sm:$0xff]  ;;  %v110_v40 = vld [vmem:[#allocation5 + $0x18] sm:$0xff]  ;;  %v127_v41 = vld [vmem:[#allocation5 + $0xa0] sm:$0xff] }
  0x3e   :  { %577 = vmatpush1.bf16.msra.mxu1 %v514_v38  ;;  %515 = vmatpush1.bf16.msra.mxu0 %v514_v38  ;;  %v107_v38 = vld [vmem:[#allocation5] sm:$0xff]  ;;  %v109_v42 = vld [vmem:[#allocation5 + $0x10] sm:$0xff]  ;;  %v130_v43 = vld [vmem:[#allocation5 + $0xb8] sm:$0xff] }
  0x3f   :  { %562 = vmatprep.subr.bf16.mxu1 %v516_v39  ;;  %517 = vmatprep.subr.bf16.mxu0 %v516_v39  ;;  %v128_v39 = vld [vmem:[#allocation5 + $0xa8] sm:$0xff]  ;;  %v129_v45 = vld [vmem:[#allocation5 + $0xb0] sm:$0xff]  ;;  %v131_v50 = vld [vmem:[#allocation5 + $0xc0] sm:$0xff] }
  0x40   :  { %v112_v44 = vld [vmem:[#allocation5 + $0x28] sm:$0xff]  ;;  %v113_v49 = vld [vmem:[#allocation5 + $0x30] sm:$0xff]  ;;  %v134_v51 = vld [vmem:[#allocation5 + $0xd8] sm:$0xff] }
  0x41   :  { %v132_v48 = vld [vmem:[#allocation5 + $0xc8] sm:$0xff]  ;;  %v115_v54 = vld [vmem:[#allocation5 + $0x40] sm:$0xff]  ;;  %v118_v55 = vld [vmem:[#allocation5 + $0x58] sm:$0xff] }
  0x42   :  { %578 = vmatpush1.bf16.msra.mxu1 %v518_v46  ;;  %519 = vmatpush1.bf16.msra.mxu0 %v518_v46  ;;  %v111_v46 = vld [vmem:[#allocation5 + $0x20] sm:$0xff]  ;;  %v136_v56 = vld [vmem:[#allocation5 + $0xe8] sm:$0xff]  ;;  %v117_v57 = vld [vmem:[#allocation5 + $0x50] sm:$0xff] }
  0x43   :  { %563 = vmatprep.subr.bf16.mxu1 %v520_v47  ;;  %521 = vmatprep.subr.bf16.mxu0 %v520_v47  ;;  %v114_v47 = vld [vmem:[#allocation5 + $0x38] sm:$0xff]  ;;  %v120_v59 = vld [vmem:[#allocation5 + $0x68] sm:$0xff]  ;;  %v119_v61 = vld [vmem:[#allocation5 + $0x60] sm:$0xff] }
  0x44   :  { %v137_v62 = vld [vmem:[#allocation5 + $0xf0] sm:$0xff]  ;;  %v122_v63 = vld [vmem:[#allocation5 + $0x78] sm:$0xff]  ;;  %v140_v0 = vld [vmem:[#allocation5 + $0x108] sm:$0xff] }
  0x45   :  { %v121_v1 = vld [vmem:[#allocation5 + $0x70] sm:$0xff]  ;;  %v142_v4 = vld [vmem:[#allocation5 + $0x118] sm:$0xff]  ;;  %v123_v5 = vld [vmem:[#allocation5 + $0x80] sm:$0xff] }
  0x46   :  { %579 = vmatpush1.bf16.msra.mxu1 %v522_v52  ;;  %523 = vmatpush1.bf16.msra.mxu0 %v522_v52  ;;  %v116_v52 = vld [vmem:[#allocation5 + $0x48] sm:$0xff]  ;;  %v141_v6 = vld [vmem:[#allocation5 + $0x110] sm:$0xff] }
  0x47   :  { %564 = vmatprep.subr.bf16.mxu1 %v524_v53  ;;  %525 = vmatprep.subr.bf16.mxu0 %v524_v53  ;;  %v133_v53 = vld [vmem:[#allocation5 + $0xd0] sm:$0xff] }
  0x4a   :  { %580 = vmatpush1.bf16.msra.mxu1 %v526_v58  ;;  %527 = vmatpush1.bf16.msra.mxu0 %v526_v58  ;;  %v135_v58 = vld [vmem:[#allocation5 + $0xe0] sm:$0xff] }
  0x4b   :  { %565 = vmatprep.subr.bf16.mxu1 %v528_v60  ;;  %529 = vmatprep.subr.bf16.mxu0 %v528_v60  ;;  %v138_v60 = vld [vmem:[#allocation5 + $0xf8] sm:$0xff] }
  0x4e   :  { %581 = vmatpush1.bf16.msra.mxu1 %v530_v2  ;;  %531 = vmatpush1.bf16.msra.mxu0 %v530_v2  ;;  %v139_v2 = vld [vmem:[#allocation5 + $0x100] sm:$0xff] }
  0x4f   :  { %566 = vmatprep.subr.bf16.mxu1 %v532_v3  ;;  %533 = vmatprep.subr.bf16.mxu0 %v532_v3  ;;  %v124_v3 = vld [vmem:[#allocation5 + $0x88] sm:$0xff] }
  0x52   :  { %582 = vmatpush1.bf16.msra.mxu1 %v534_v8  ;;  %535 = vmatpush1.bf16.msra.mxu0 %v534_v8 }
  0x53   :  { %567 = vmatprep.subr.bf16.mxu1 %v536_v9  ;;  %537 = vmatprep.subr.bf16.mxu0 %v536_v9 }
  0x56   :  { %583 = vmatpush1.bf16.msra.mxu1 %v538_v14  ;;  %539 = vmatpush1.bf16.msra.mxu0 %v538_v14 }
  0x57   :  { %568 = vmatprep.subr.bf16.mxu1 %v540_v15  ;;  %541 = vmatprep.subr.bf16.mxu0 %v540_v15 }
  0x5a   :  { %584 = vmatpush1.bf16.msra.mxu1 %v542_v20  ;;  %543 = vmatpush1.bf16.msra.mxu0 %v542_v20 }
  0x5b   :  { %569 = vmatprep.subr.bf16.mxu1 %v544_v21  ;;  %545 = vmatprep.subr.bf16.mxu0 %v544_v21 }
  0x5e   :  { %585 = vmatpush1.bf16.msra.mxu1 %v546_v26  ;;  %547 = vmatpush1.bf16.msra.mxu0 %v546_v26 }
  0x5f   :  { %570 = vmatprep.subr.bf16.mxu1 %v548_v27  ;;  %549 = vmatprep.subr.bf16.mxu0 %v548_v27 }
  0x62   :  { %586 = vmatpush1.bf16.msra.mxu1 %v550_v32  ;;  %551 = vmatpush1.bf16.msra.mxu0 %v550_v32 }
  0x63   :  { %571 = vmatprep.subr.bf16.mxu1 %v552_v33  ;;  %553 = vmatprep.subr.bf16.mxu0 %v552_v33 }
  0x66   :  { %587 = vmatpush1.bf16.msra.mxu1 %v554_v36  ;;  %555 = vmatpush1.bf16.msra.mxu0 %v554_v36 }
  0x69   :  { %262 = vmatmul.mubr.f32.vlgmr.msra.gmra.mrb[0].mxu1 %v125_v37  ;;  %208 = vmatmul.mubr.f32.vlgmr.msra.gmra.mrb[0].mxu0 %v107_v38 }
  0x6a   :  { %267 = vmatprep.mubr.f32.mxu1 %v128_v39  ;;  %213 = vmatprep.mubr.f32.mxu0 %v110_v40 }
  0x6d   :  { %268 = vmatmul.mubr.f32.gmra.mrb[2].mxu1 %v127_v41  ;;  %214 = vmatmul.mubr.f32.gmra.mrb[2].mxu0 %v109_v42 }
  0x6e   :  { %273 = vmatprep.mubr.f32.mxu1 %v130_v43  ;;  %219 = vmatprep.mubr.f32.mxu0 %v112_v44 }
  0x71   :  { %274 = vmatmul.mubr.f32.gmra.mrb[4].mxu1 %v129_v45  ;;  %220 = vmatmul.mubr.f32.gmra.mrb[4].mxu0 %v111_v46 }
  0x72   :  { %225 = vmatprep.mubr.f32.mxu0 %v114_v47  ;;  %279 = vmatprep.mubr.f32.mxu1 %v132_v48 }
  0x75   :  { %226 = vmatmul.mubr.f32.gmra.mrb[6].mxu0 %v113_v49  ;;  %280 = vmatmul.mubr.f32.gmra.mrb[6].mxu1 %v131_v50 }
  0x76   :  { %285 = vmatprep.mubr.f32.mxu1 %v134_v51  ;;  %231 = vmatprep.mubr.f32.mxu0 %v116_v52 }
  0x79   :  { %286 = vmatmul.mubr.f32.gmra.mrb[8].mxu1 %v133_v53  ;;  %232 = vmatmul.mubr.f32.gmra.mrb[8].mxu0 %v115_v54 }
  0x7a   :  { %237 = vmatprep.mubr.f32.mxu0 %v118_v55  ;;  %291 = vmatprep.mubr.f32.mxu1 %v136_v56 }
  0x7d   :  { %238 = vmatmul.mubr.f32.gmra.mrb[10].mxu0 %v117_v57  ;;  %292 = vmatmul.mubr.f32.gmra.mrb[10].mxu1 %v135_v58 }
  0x7e   :  { %243 = vmatprep.mubr.f32.mxu0 %v120_v59  ;;  %297 = vmatprep.mubr.f32.mxu1 %v138_v60 }
  0x81   :  { %244 = vmatmul.mubr.f32.gmra.mrb[12].mxu0 %v119_v61  ;;  %298 = vmatmul.mubr.f32.gmra.mrb[12].mxu1 %v137_v62  ;;  %v324_v62 = vlaneseq }
  0x82   :  { %249 = vmatprep.mubr.f32.mxu0 %v122_v63  ;;  %303 = vmatprep.mubr.f32.mxu1 %v140_v0 }
  0x85   :  { %250 = vmatmul.mubr.f32.gmra.mrb[14].mxu0 %v121_v1  ;;  %304 = vmatmul.mubr.f32.gmra.mrb[14].mxu1 %v139_v2  ;;  %v776_v1 = vand.u32 127, %v324_v62 }
  0x86   :  { %255 = vmatprep.mubr.f32.mxu0 %v124_v3  ;;  %309 = vmatprep.mubr.f32.mxu1 %v142_v4 }
  0x87   :  { %vm326_vm0 = vcmp.lt.s32.totalorder %v776_v1, 127  ;;  %vm343_vm1 = vcmp.lt.s32.totalorder %v776_v1, 126  ;;  %vm377_vm2 = vcmp.lt.s32.totalorder %v776_v1, 117  ;;  %vm360_vm3 = vcmp.lt.s32.totalorder %v776_v1, 118 }
  0x88   :  { %vm394_vm4 = vcmp.lt.s32.totalorder %v776_v1, 116  ;;  %vm411_vm5 = vcmp.lt.s32.totalorder %v776_v1, 108  ;;  %vm428_vm6 = vcmp.lt.s32.totalorder %v776_v1, 107  ;;  %vm445_vm7 = vcmp.lt.s32.totalorder %v776_v1, 106 }
  0x89   :  { %256 = vmatmul.mubr.f32.gmra.mrb[16].mxu0 %v123_v5  ;;  %310 = vmatmul.mubr.f32.gmra.mrb[16].mxu1 %v141_v6 }
  0xb4   :  { %v758_v43 = vpop.permute.xlu1 %463  ;;  %v760_v44 = vpop.permute.xlu0 %458 }
 0x13c   :  { %v263_v7 = vpop.f32.mrb[0].mxu1  ;;  %v746_v8 = vpop.f32.mrb[0].mxu0 }
 0x13d   :  { %371 = vrot.lane.b32.xlu1 %v263_v7, %s681_s2  ;;  %v265_v9 = vpop.f32.mrb[1].mxu1  ;;  %v749_v10 = vpop.f32.mrb[1].mxu0 }
 0x140   :  { %v269_v11 = vpop.f32.mrb[2].mxu1  ;;  %v751_v12 = vpop.f32.mrb[2].mxu0 }
 0x141   :  { %375 = vrot.lane.b32.xlu1 %v265_v9, %s681_s2  ;;  %386 = vrot.lane.b32.xlu0 %v269_v11, %s682_s13  ;;  %v271_v13 = vpop.f32.mrb[3].mxu1  ;;  %v754_v14 = vpop.f32.mrb[3].mxu0 }
 0x144   :  { %v275_v15 = vpop.f32.mrb[4].mxu1  ;;  %v221_v16 = vpop.f32.mrb[4].mxu0 }
 0x145   :  { %390 = vrot.lane.b32.xlu0 %v271_v13, %s682_s13  ;;  %388 = vrot.lane.b32.xlu1 %v275_v15, %s682_s13  ;;  %v223_v17 = vpop.f32.mrb[5].mxu0  ;;  %v277_v18 = vpop.f32.mrb[5].mxu1 }
 0x148   :  { %v227_v19 = vpop.f32.mrb[6].mxu0  ;;  %v281_v20 = vpop.f32.mrb[6].mxu1 }
 0x149   :  { %316 = vrot.lane.b32.xlu0 %v221_v16, %s683_s14  ;;  %320 = vrot.lane.b32.xlu1 %v223_v17, %s683_s14  ;;  %v229_v21 = vpop.f32.mrb[7].mxu0  ;;  %v283_v22 = vpop.f32.mrb[7].mxu1 }
 0x14c   :  { %v287_v23 = vpop.f32.mrb[8].mxu1  ;;  %v233_v24 = vpop.f32.mrb[8].mxu0 }
 0x14d   :  { %392 = vrot.lane.b32.xlu1 %v277_v18, %s682_s13  ;;  %318 = vrot.lane.b32.xlu0 %v227_v19, %s683_s14  ;;  %v235_v25 = vpop.f32.mrb[9].mxu0  ;;  %v289_v26 = vpop.f32.mrb[9].mxu1 }
 0x150   :  { %v239_v27 = vpop.f32.mrb[10].mxu0  ;;  %v293_v28 = vpop.f32.mrb[10].mxu1 }
 0x151   :  { %403 = vrot.lane.b32.xlu0 %v281_v20, %s684_s15  ;;  %322 = vrot.lane.b32.xlu1 %v229_v21, %s683_s14  ;;  %v241_v29 = vpop.f32.mrb[11].mxu0  ;;  %v295_v30 = vpop.f32.mrb[11].mxu1 }
 0x154   :  { %v245_v31 = vpop.f32.mrb[12].mxu0  ;;  %v299_v32 = vpop.f32.mrb[12].mxu1 }
 0x155   :  { %407 = vrot.lane.b32.xlu0 %v283_v22, %s684_s15  ;;  %405 = vrot.lane.b32.xlu1 %v287_v23, %s684_s15  ;;  %v247_v33 = vpop.f32.mrb[13].mxu0  ;;  %v301_v34 = vpop.f32.mrb[13].mxu1 }
 0x158   :  { %v251_v35 = vpop.f32.mrb[14].mxu0  ;;  %v305_v36 = vpop.f32.mrb[14].mxu1 }
 0x159   :  { %409 = vrot.lane.b32.xlu1 %v289_v26, %s684_s15  ;;  %335 = vrot.lane.b32.xlu0 %v233_v24, %s685_s16  ;;  %v253_v37 = vpop.f32.mrb[15].mxu0  ;;  %v307_v38 = vpop.f32.mrb[15].mxu1 }
 0x15c   :  { %v257_v39 = vpop.f32.mrb[16].mxu0  ;;  %v311_v40 = vpop.f32.mrb[16].mxu1 }
 0x15d   :  { %339 = vrot.lane.b32.xlu0 %v235_v25, %s685_s16  ;;  %337 = vrot.lane.b32.xlu1 %v239_v27, %s685_s16  ;;  %v259_v41 = vpop.f32.mrb[17].mxu0  ;;  %v313_v42 = vpop.f32.mrb[17].mxu1 }
 0x161   :  { %420 = vrot.lane.b32.xlu1 %v293_v28, %s686_s17  ;;  %352 = vrot.lane.b32.xlu0 %v245_v31, %s687_s18 }
 0x165   :  { %341 = vrot.lane.b32.xlu1 %v241_v29, %s685_s16  ;;  %422 = vrot.lane.b32.xlu0 %v299_v32, %s686_s17 }
 0x169   :  { %356 = vrot.lane.b32.xlu0 %v247_v33, %s687_s18  ;;  %354 = vrot.lane.b32.xlu1 %v251_v35, %s687_s18 }
 0x16d   :  { %426 = vrot.lane.b32.xlu0 %v301_v34, %s686_s17  ;;  %358 = vrot.lane.b32.xlu1 %v253_v37, %s687_s18 }
 0x171   :  { %424 = vrot.lane.b32.xlu1 %v295_v30, %s686_s17  ;;  %369 = vrot.lane.b32.xlu0 %v257_v39, %s681_s2 }
 0x175   :  { %437 = vrot.lane.b32.xlu1 %v305_v36, %s688_s19  ;;  %373 = vrot.lane.b32.xlu0 %v259_v41, %s681_s2 }
 0x179   :  { %441 = vrot.lane.b32.xlu1 %v307_v38, %s688_s19  ;;  %439 = vrot.lane.b32.xlu0 %v311_v40, %s688_s19 }
 0x17d   :  { %443 = vrot.lane.b32.xlu0 %v313_v42, %s688_s19 }
 0x1af   :  { %v372_v45 = vpop.permute.xlu1 %371 }
 0x1b3   :  { %v376_v46 = vpop.permute.xlu1 %375  ;;  %v762_v47 = vpop.permute.xlu0 %386 }
 0x1b4   :  { %v379_v24 = vsel %vm377_vm2, %v372_v45, %v376_v46  ;;  %v381_v25 = vsel %vm377_vm2, %v376_v46, %v372_v45 }
 0x1b7   :  { %v764_v48 = vpop.permute.xlu0 %390  ;;  %v389_v49 = vpop.permute.xlu1 %388 }
 0x1bb   :  { %v317_v50 = vpop.permute.xlu0 %316  ;;  %v321_v51 = vpop.permute.xlu1 %320 }
 0x1bc   :  { %v327_v20 = vsel %vm326_vm0, %v317_v50, %v321_v51  ;;  %v329_v21 = vsel %vm326_vm0, %v321_v51, %v317_v50 }
 0x1bd   :  { %v331_v28 = vadd.f32 %v327_v20, %v746_v8  ;;  %v332_v29 = vadd.f32 %v329_v21, %v749_v10 }
 0x1bf   :  { %v393_v52 = vpop.permute.xlu1 %392  ;;  %v319_v53 = vpop.permute.xlu0 %318 }
 0x1c0   :  { %v396_v38 = vsel %vm394_vm4, %v389_v49, %v393_v52  ;;  %v398_v8 = vsel %vm394_vm4, %v393_v52, %v389_v49  ;;  %v395_v49 = vsel %vm394_vm4, %v762_v47, %v764_v48  ;;  %v397_v52 = vsel %vm394_vm4, %v764_v48, %v762_v47 }
 0x1c3   :  { %v766_v54 = vpop.permute.xlu0 %403  ;;  %v323_v55 = vpop.permute.xlu1 %322 }
 0x1c4   :  { %v328_v4 = vsel %vm326_vm0, %v319_v53, %v323_v55  ;;  %v330_v5 = vsel %vm326_vm0, %v323_v55, %v319_v53 }
 0x1c5   :  { %v333_v13 = vadd.f32 %v328_v4, %v751_v12  ;;  %v334_v15 = vadd.f32 %v330_v5, %v754_v14 }
 0x1c7   :  { %v768_v56 = vpop.permute.xlu0 %407  ;;  %v770_v57 = vpop.permute.xlu1 %405 }
 0x1c8   :  { %v412_v4 = vsel %vm411_vm5, %v766_v54, %v768_v56  ;;  %v414_v5 = vsel %vm411_vm5, %v768_v56, %v766_v54 }
 0x1cb   :  { %v772_v58 = vpop.permute.xlu1 %409  ;;  %v336_v59 = vpop.permute.xlu0 %335 }
 0x1cc   :  { %v413_v55 = vsel %vm411_vm5, %v770_v57, %v772_v58 }
 0x1cf   :  { %v340_v60 = vpop.permute.xlu0 %339  ;;  %v338_v61 = vpop.permute.xlu1 %337 }
 0x1d0   :  { %v344_v26 = vsel %vm343_vm1, %v336_v59, %v340_v60  ;;  %v346_v27 = vsel %vm343_vm1, %v340_v60, %v336_v59  ;;  %v415_v59 = vsel %vm411_vm5, %v772_v58, %v770_v57 }
 0x1d1   :  { %v348_v36 = vadd.f32 %v344_v26, %v331_v28  ;;  %v349_v37 = vadd.f32 %v346_v27, %v332_v29 }
 0x1d3   :  { %v774_v63 = vpop.permute.xlu1 %420  ;;  %v353_v0 = vpop.permute.xlu0 %352 }
 0x1d7   :  { %v342_v2 = vpop.permute.xlu1 %341  ;;  %v778_v3 = vpop.permute.xlu0 %422 }
 0x1d8   :  { %v345_v9 = vsel %vm343_vm1, %v338_v61, %v342_v2  ;;  %v347_v11 = vsel %vm343_vm1, %v342_v2, %v338_v61 }
 0x1d9   :  { %v350_v16 = vadd.f32 %v345_v9, %v333_v13  ;;  %v351_v17 = vadd.f32 %v347_v11, %v334_v15 }
 0x1db   :  { %v357_v6 = vpop.permute.xlu0 %356  ;;  %v355_v7 = vpop.permute.xlu1 %354 }
 0x1dc   :  { %v361_v34 = vsel %vm360_vm3, %v353_v0, %v357_v6  ;;  %v363_v35 = vsel %vm360_vm3, %v357_v6, %v353_v0 }
 0x1dd   :  { %v365_v10 = vadd.f32 %v361_v34, %v348_v36  ;;  %v366_v39 = vadd.f32 %v363_v35, %v349_v37 }
 0x1df   :  { %v427_v18 = vpop.permute.xlu0 %426  ;;  %v359_v19 = vpop.permute.xlu1 %358 }
 0x1e0   :  { %v362_v22 = vsel %vm360_vm3, %v355_v7, %v359_v19  ;;  %v364_v12 = vsel %vm360_vm3, %v359_v19, %v355_v7  ;;  %v430_v57 = vsel %vm428_vm6, %v778_v3, %v427_v18  ;;  %v432_v58 = vsel %vm428_vm6, %v427_v18, %v778_v3 }
 0x1e1   :  { %v367_v14 = vadd.f32 %v362_v22, %v350_v16  ;;  %v368_v23 = vadd.f32 %v364_v12, %v351_v17 }
 0x1e3   :  { %v384_v30 = vadd.f32 %v379_v24, %v367_v14  ;;  %v385_v31 = vadd.f32 %v381_v25, %v368_v23  ;;  %v425_v32 = vpop.permute.xlu1 %424  ;;  %v370_v33 = vpop.permute.xlu0 %369 }
 0x1e4   :  { %v429_v7 = vsel %vm428_vm6, %v774_v63, %v425_v32  ;;  %v431_v54 = vsel %vm428_vm6, %v425_v32, %v774_v63 }
 0x1e5   :  { %v401_v40 = vadd.f32 %v396_v38, %v384_v30  ;;  %v402_v41 = vadd.f32 %v398_v8, %v385_v31 }
 0x1e7   :  { %v438_v42 = vpop.permute.xlu1 %437  ;;  %v374_v45 = vpop.permute.xlu0 %373  ;;  %v418_v0 = vadd.f32 %v413_v55, %v401_v40  ;;  %v419_v2 = vadd.f32 %v415_v59, %v402_v41 }
 0x1e8   :  { %v378_v46 = vsel %vm377_vm2, %v370_v33, %v374_v45  ;;  %v380_v50 = vsel %vm377_vm2, %v374_v45, %v370_v33 }
 0x1e9   :  { %v382_v51 = vadd.f32 %v378_v46, %v365_v10  ;;  %v383_v53 = vadd.f32 %v380_v50, %v366_v39  ;;  %v435_v11 = vadd.f32 %v430_v57, %v418_v0  ;;  %v436_v13 = vadd.f32 %v432_v58, %v419_v2 }
 0x1eb   :  { %v399_v60 = vadd.f32 %v395_v49, %v382_v51  ;;  %v400_v61 = vadd.f32 %v397_v52, %v383_v53  ;;  %v440_v62 = vpop.permute.xlu0 %439  ;;  %v442_v47 = vpop.permute.xlu1 %441 }
 0x1ec   :  { %v446_v16 = vsel %vm445_vm7, %v438_v42, %v442_v47  ;;  %v448_v17 = vsel %vm445_vm7, %v442_v47, %v438_v42 }
 0x1ed   :  { %v416_v48 = vadd.f32 %v412_v4, %v399_v60  ;;  %v417_v6 = vadd.f32 %v414_v5, %v400_v61 }
 0x1ef   :  { %v433_v56 = vadd.f32 %v429_v7, %v416_v48  ;;  %v434_v9 = vadd.f32 %v431_v54, %v417_v6  ;;  %v444_v15 = vpop.permute.xlu0 %443 }
 0x1f0   :  { %v447_v3 = vsel %vm445_vm7, %v440_v62, %v444_v15  ;;  %v449_v18 = vsel %vm445_vm7, %v444_v15, %v440_v62 }
 0x1f1   :  { %v450_v63 = vadd.f32 %v446_v16, %v433_v56  ;;  %v451_v19 = vadd.f32 %v448_v17, %v434_v9  ;;  %v452_v20 = vadd.f32 %v447_v3, %v435_v11  ;;  %v453_v21 = vadd.f32 %v449_v18, %v436_v13 }
 0x1f3   :  { %v466_v22 = vadd.f32 %v760_v44, %v450_v63  ;;  %v467_v12 = vadd.f32 %v760_v44, %v451_v19  ;;  %v468_v14 = vadd.f32 %v758_v43, %v452_v20  ;;  %v469_v23 = vadd.f32 %v758_v43, %v453_v21 }
 0x1f5   :  { %470 = vst [vmem:[#allocation7] sm:$0xff] %v466_v22  ;;  %471 = vst [vmem:[#allocation7 + $0x8] sm:$0xff] %v467_v12 }
 0x1f6   :  { %472 = vst [vmem:[#allocation7 + $0x10] sm:$0xff] %v468_v14  ;;  %473 = vst [vmem:[#allocation7 + $0x18] sm:$0xff] %v469_v23 }
 0x1f7   :  { %659 = shalt.err (!%p656_p6)
}
 0x1f8   :  { %s660_s27 = scalar_lea.hbm %s886_s3, 512 }
 0x1f9   :  { %p661_p7 = scmp.ne.s32.totalorder %s886_s3, %s660_s27  ;;  %p664_p8 = scmp.lt.u32.totalorder %s660_s27, %s886_s3 }
 0x1fb   :  { %p666_p9 = pnand %p664_p8, %p661_p7 }
 0x1fd   :  { %669 = shalt.err (!%p666_p9)
}
 0x1fe   :  { %485 = dma.vmem_to_hbm [thread:$0]  %s480_s21, 512, %s886_s3, [#allocation4], %s677_s22, %s677_s22, %s678_s23  }
 0x1ff   :  { %674 = dma.done.wait [#allocation4], 512  }
 0x200   :  { %675 = vsyncadd [#allocation4], 4294966784 }
 0x201   :  { %489 = vsyncpa [#allocation3], 1 }
 0x202   :  { %490 = vsyncpa [#allocation6], 1 }
 0x203   :  { %491 = vsyncpa [#allocation4], 1 }

</bundles_post_ra>
